<compile_context>
chip_gen: v5e
topology: v5e:2x2
jax: 0.10.0
libtpu: 0.0.40
codegen_flags: <defaults>
</compile_context>

<pallas_src>
import functools

import jax
import jax.numpy as jnp
from jax.experimental import pallas as pl
from jax.experimental.pallas import tpu as pltpu


def _round_up(v, m):
    return ((v + m - 1) // m) * m


def _softplus(v):
    # PyTorch nn.Softplus default: beta=1, threshold=20 -> identity above 20.
    safe = jnp.minimum(v, 20.0)
    return jnp.where(v > 20.0, v, jnp.log1p(jnp.exp(safe)))


def _default_bf16_activations():
    """bf16 bias/ReLU only on chips with a bf16 VALU (v6e, v7x)."""
    try:
        kind = jax.devices()[0].device_kind.lower()
    except Exception:
        return True
    return not any(t in kind for t in ("v2", "v3", "v4", "v5"))


def _visibility_kernel(x_ref,
                       w1_ref, b1_ref,
                       w2_ref, b2_ref,
                       w3_ref, b3_ref,
                       w4_ref, b4_ref,
                       w5_ref, b5_ref,
                       o_ref,
                       *, act_dtype):
    zero = jnp.asarray(0.0, act_dtype)

    # 4x [Linear + ReLU], unrolled at trace time.
    # MXU operands bf16, f32 accumulation; bias/ReLU in act_dtype
    # (bf16 on v6e/v7x, f32 on v5e).
    h = x_ref[...]
    for w_ref, b_ref in ((w1_ref, b1_ref), (w2_ref, b2_ref),
                         (w3_ref, b3_ref), (w4_ref, b4_ref)):
        acc = jnp.dot(h.astype(jnp.bfloat16), w_ref[...],
                      preferred_element_type=jnp.float32)
        h = jnp.maximum(acc.astype(act_dtype) + b_ref[...].astype(act_dtype),
                        zero)

    # Visibility head: (tile_n,128) x (128,1) as VPU multiply + XLU lane
    # reduce instead of an MXU matmul with a width-1 output.  Softplus is
    # applied in the wrapper on the tiny (N,1) result (lane-dense there).
    v = jnp.sum(h.astype(jnp.float32) * w5_ref[...], axis=-1, keepdims=True)
    o_ref[...] = (v + b5_ref[...]).astype(o_ref.dtype)


def init_visibility_params(key, in_channel_xyz=60, in_channel_dir=24, W=128,
                           dtype=jnp.float32):
    """Deterministic synthetic parameters matching the PyTorch module shapes."""
    fin = in_channel_xyz + in_channel_dir
    dims = [(fin, W), (W, W), (W, W), (W, W), (W, 1)]
    params = {}
    keys = jax.random.split(key, 2 * len(dims))
    for i, (din, dout) in enumerate(dims):
        kw, kb = keys[2 * i], keys[2 * i + 1]
        scale = 1.0 / jnp.sqrt(jnp.asarray(din, dtype=jnp.float32))
        # Stored as (in, out) so the kernel computes x @ W (PyTorch is (out, in)).
        params[f"w{i+1}"] = (jax.random.uniform(kw, (din, dout), dtype,
                                                minval=-1.0, maxval=1.0) * scale)
        params[f"b{i+1}"] = (jax.random.uniform(kb, (1, dout), dtype,
                                                minval=-1.0, maxval=1.0) * scale)
    return params


def visibility_forward(x, params, tile_n=8192, bf16_activations=None):
    """x: (N, in_channel_xyz + in_channel_dir) -> (N, 1)."""
    N, F = x.shape
    out_dtype = x.dtype
    W = params["w1"].shape[1]

    if bf16_activations is None:
        bf16_activations = _default_bf16_activations()
    act_dtype = jnp.bfloat16 if bf16_activations else jnp.float32

    # Weights to bf16 (MXU operands); head row + biases stay f32 and are cast
    # inside the kernel as needed.  No padding of x: K stays at F in the
    # first dot (Mosaic lane-pads in VMEM for free).
    w1 = params["w1"].astype(jnp.bfloat16)                    # (F, W)
    w2 = params["w2"].astype(jnp.bfloat16)
    w3 = params["w3"].astype(jnp.bfloat16)
    w4 = params["w4"].astype(jnp.bfloat16)
    b1 = params["b1"].astype(jnp.float32)
    b2 = params["b2"].astype(jnp.float32)
    b3 = params["b3"].astype(jnp.float32)
    b4 = params["b4"].astype(jnp.float32)
    w5_row = params["w5"].reshape(1, W).astype(jnp.float32)   # (1, W) VPU head
    b5 = params["b5"].reshape(1, 1).astype(jnp.float32)       # (1, 1)

    # Row tiling: big tiles amortize the ~0.35us grid-step overhead; cap so
    # the grid keeps >= 4 steps when N allows (v7x: 2 TCs stay balanced).
    tile_n = max(8, _round_up(int(tile_n), 8))
    cap = _round_up(max(pl.cdiv(N, 4), 8), 8)
    tile_n = min(tile_n, cap)
    grid = (pl.cdiv(N, tile_n),)   # ragged final block handled by Pallas

    def _full(shape):
        return pl.BlockSpec(shape, lambda i: (0, 0))

    in_specs = [
        pl.BlockSpec((tile_n, F), lambda i: (i, 0)),   # x row tile, unpadded
        _full((F, W)), _full((1, W)),                  # w1, b1
        _full((W, W)), _full((1, W)),                  # w2, b2
        _full((W, W)), _full((1, W)),                  # w3, b3
        _full((W, W)), _full((1, W)),                  # w4, b4
        _full((1, W)), _full((1, 1)),                  # w5 row, b5
    ]

    v = pl.pallas_call(
        functools.partial(_visibility_kernel, act_dtype=act_dtype),
        out_shape=jax.ShapeDtypeStruct((N, 1), jnp.float32),
        grid_spec=pltpu.PrefetchScalarGridSpec(
            num_scalar_prefetch=0,
            grid=grid,
            in_specs=in_specs,
            out_specs=pl.BlockSpec((tile_n, 1), lambda i: (i, 0)),
        ),
        compiler_params=pltpu.CompilerParams(
            dimension_semantics=("parallel",),
            vmem_limit_bytes=48 * 1024 * 1024,
        ),
    )(x, w1, b1, w2, b2, w3, b3, w4, b4, w5_row, b5)

    # Softplus on the tiny (N, 1) output (negligible HBM traffic); matches
    # PyTorch's beta=1 / threshold=20 semantics.
    return _softplus(v).astype(out_dtype)


def _reference_forward(x, params, bf16_activations):
    """Pure-JAX reference mimicking the kernel's precision path."""
    act_dtype = jnp.bfloat16 if bf16_activations else jnp.float32
    h = x
    for i in range(1, 5):
        acc = jnp.dot(h.astype(jnp.bfloat16),
                      params[f"w{i}"].astype(jnp.bfloat16),
                      preferred_element_type=jnp.float32)
        h = jnp.maximum(acc.astype(act_dtype)
                        + params[f"b{i}"].astype(act_dtype), 0.0)
    v = jnp.sum(h.astype(jnp.float32) * params["w5"].reshape(1, -1),
                axis=-1, keepdims=True) + params["b5"]
    return _softplus(v)


if __name__ == "__main__":
    key = jax.random.PRNGKey(0)
    k_param, k_x = jax.random.split(key)

    in_channel_xyz, in_channel_dir, W = 60, 24, 128
    N = 16  # small batch of rays

    params = init_visibility_params(k_param, in_channel_xyz, in_channel_dir, W)
    x = jax.random.normal(k_x, (N, in_channel_xyz + in_channel_dir), jnp.float32)

    bf16_act = _default_bf16_activations()
    out = visibility_forward(x, params, bf16_activations=bf16_act)
    out = jax.block_until_ready(out)

    ref = _reference_forward(x, params, bf16_act)
    assert out.shape == (N, 1), out.shape
    assert jnp.allclose(out, ref, atol=2e-3, rtol=2e-3), float(
        jnp.max(jnp.abs(out - ref)))

    print("KERNEL_OK")
</pallas_src>

<mosaic_0001>
module attributes {stable_mosaic.version = 11 : i64} {
  func.func @_visibility_kernel(%arg0: i32, %arg1: memref<8x84xf32, #tpu.memory_space<vmem>>, %arg2: memref<84x128xbf16, #tpu.memory_space<vmem>>, %arg3: memref<1x128xf32, #tpu.memory_space<vmem>>, %arg4: memref<128x128xbf16, #tpu.memory_space<vmem>>, %arg5: memref<1x128xf32, #tpu.memory_space<vmem>>, %arg6: memref<128x128xbf16, #tpu.memory_space<vmem>>, %arg7: memref<1x128xf32, #tpu.memory_space<vmem>>, %arg8: memref<128x128xbf16, #tpu.memory_space<vmem>>, %arg9: memref<1x128xf32, #tpu.memory_space<vmem>>, %arg10: memref<1x128xf32, #tpu.memory_space<vmem>>, %arg11: memref<1x1xf32, #tpu.memory_space<vmem>>, %arg12: memref<8x1xf32, #tpu.memory_space<vmem>>) attributes {dimension_semantics = [#tpu.dimension_semantics<parallel>], iteration_bounds = array<i64: 2>, scalar_prefetch = 0 : i64, scratch_operands = 0 : i64, tpu.core_type = #tpu.core_type<tc>, window_params = [{transform_indices = @transform_0, window_bounds = array<i64: 8, 84>}, {pipeline_mode = #tpu.pipeline_mode<synchronous>, transform_indices = @transform_1, window_bounds = array<i64: 84, 128>}, {pipeline_mode = #tpu.pipeline_mode<synchronous>, transform_indices = @transform_2, window_bounds = array<i64: 1, 128>}, {pipeline_mode = #tpu.pipeline_mode<synchronous>, transform_indices = @transform_3, window_bounds = array<i64: 128, 128>}, {pipeline_mode = #tpu.pipeline_mode<synchronous>, transform_indices = @transform_4, window_bounds = array<i64: 1, 128>}, {pipeline_mode = #tpu.pipeline_mode<synchronous>, transform_indices = @transform_5, window_bounds = array<i64: 128, 128>}, {pipeline_mode = #tpu.pipeline_mode<synchronous>, transform_indices = @transform_6, window_bounds = array<i64: 1, 128>}, {pipeline_mode = #tpu.pipeline_mode<synchronous>, transform_indices = @transform_7, window_bounds = array<i64: 128, 128>}, {pipeline_mode = #tpu.pipeline_mode<synchronous>, transform_indices = @transform_8, window_bounds = array<i64: 1, 128>}, {pipeline_mode = #tpu.pipeline_mode<synchronous>, transform_indices = @transform_9, window_bounds = array<i64: 1, 128>}, {pipeline_mode = #tpu.pipeline_mode<synchronous>, transform_indices = @transform_10, window_bounds = array<i64: 1, 1>}, {transform_indices = @transform_11, window_bounds = array<i64: 8, 1>}]} {
    %c0 = arith.constant 0 : index
    %c0_0 = arith.constant 0 : index
    %0 = vector.load %arg1[%c0, %c0_0] : memref<8x84xf32, #tpu.memory_space<vmem>>, vector<8x84xf32>
    %1 = arith.truncf %0 : vector<8x84xf32> to vector<8x84xbf16>
    %c0_1 = arith.constant 0 : index
    %c0_2 = arith.constant 0 : index
    %2 = vector.load %arg2[%c0_1, %c0_2] : memref<84x128xbf16, #tpu.memory_space<vmem>>, vector<84x128xbf16>
    %cst = arith.constant dense<0.000000e+00> : vector<8x128xf32>
    %3 = tpu.matmul %1, %2, %cst {dimension_numbers = #tpu.dot_dimension_numbers<[1], [0], [0], [1], [0, 0, 1, 1], [], []>} : vector<8x84xbf16>, vector<84x128xbf16>, vector<8x128xf32> -> vector<8x128xf32>
    %4 = arith.truncf %3 : vector<8x128xf32> to vector<8x128xbf16>
    %c0_3 = arith.constant 0 : index
    %c0_4 = arith.constant 0 : index
    %5 = vector.load %arg3[%c0_3, %c0_4] : memref<1x128xf32, #tpu.memory_space<vmem>>, vector<1x128xf32>
    %6 = arith.truncf %5 : vector<1x128xf32> to vector<1x128xbf16>
    %7 = vector.broadcast %6 : vector<1x128xbf16> to vector<8x128xbf16>
    %8 = arith.addf %4, %7 : vector<8x128xbf16>
    %cst_5 = arith.constant 0.000000e+00 : bf16
    %9 = vector.broadcast %cst_5 : bf16 to vector<8x128xbf16>
    %10 = arith.maximumf %8, %9 : vector<8x128xbf16>
    %c0_6 = arith.constant 0 : index
    %c0_7 = arith.constant 0 : index
    %11 = vector.load %arg4[%c0_6, %c0_7] : memref<128x128xbf16, #tpu.memory_space<vmem>>, vector<128x128xbf16>
    %cst_8 = arith.constant dense<0.000000e+00> : vector<8x128xf32>
    %12 = tpu.matmul %10, %11, %cst_8 {dimension_numbers = #tpu.dot_dimension_numbers<[1], [0], [0], [1], [0, 0, 1, 1], [], []>} : vector<8x128xbf16>, vector<128x128xbf16>, vector<8x128xf32> -> vector<8x128xf32>
    %13 = arith.truncf %12 : vector<8x128xf32> to vector<8x128xbf16>
    %c0_9 = arith.constant 0 : index
    %c0_10 = arith.constant 0 : index
    %14 = vector.load %arg5[%c0_9, %c0_10] : memref<1x128xf32, #tpu.memory_space<vmem>>, vector<1x128xf32>
    %15 = arith.truncf %14 : vector<1x128xf32> to vector<1x128xbf16>
    %16 = vector.broadcast %15 : vector<1x128xbf16> to vector<8x128xbf16>
    %17 = arith.addf %13, %16 : vector<8x128xbf16>
    %cst_11 = arith.constant 0.000000e+00 : bf16
    %18 = vector.broadcast %cst_11 : bf16 to vector<8x128xbf16>
    %19 = arith.maximumf %17, %18 : vector<8x128xbf16>
    %c0_12 = arith.constant 0 : index
    %c0_13 = arith.constant 0 : index
    %20 = vector.load %arg6[%c0_12, %c0_13] : memref<128x128xbf16, #tpu.memory_space<vmem>>, vector<128x128xbf16>
    %cst_14 = arith.constant dense<0.000000e+00> : vector<8x128xf32>
    %21 = tpu.matmul %19, %20, %cst_14 {dimension_numbers = #tpu.dot_dimension_numbers<[1], [0], [0], [1], [0, 0, 1, 1], [], []>} : vector<8x128xbf16>, vector<128x128xbf16>, vector<8x128xf32> -> vector<8x128xf32>
    %22 = arith.truncf %21 : vector<8x128xf32> to vector<8x128xbf16>
    %c0_15 = arith.constant 0 : index
    %c0_16 = arith.constant 0 : index
    %23 = vector.load %arg7[%c0_15, %c0_16] : memref<1x128xf32, #tpu.memory_space<vmem>>, vector<1x128xf32>
    %24 = arith.truncf %23 : vector<1x128xf32> to vector<1x128xbf16>
    %25 = vector.broadcast %24 : vector<1x128xbf16> to vector<8x128xbf16>
    %26 = arith.addf %22, %25 : vector<8x128xbf16>
    %cst_17 = arith.constant 0.000000e+00 : bf16
    %27 = vector.broadcast %cst_17 : bf16 to vector<8x128xbf16>
    %28 = arith.maximumf %26, %27 : vector<8x128xbf16>
    %c0_18 = arith.constant 0 : index
    %c0_19 = arith.constant 0 : index
    %29 = vector.load %arg8[%c0_18, %c0_19] : memref<128x128xbf16, #tpu.memory_space<vmem>>, vector<128x128xbf16>
    %cst_20 = arith.constant dense<0.000000e+00> : vector<8x128xf32>
    %30 = tpu.matmul %28, %29, %cst_20 {dimension_numbers = #tpu.dot_dimension_numbers<[1], [0], [0], [1], [0, 0, 1, 1], [], []>} : vector<8x128xbf16>, vector<128x128xbf16>, vector<8x128xf32> -> vector<8x128xf32>
    %31 = arith.truncf %30 : vector<8x128xf32> to vector<8x128xbf16>
    %c0_21 = arith.constant 0 : index
    %c0_22 = arith.constant 0 : index
    %32 = vector.load %arg9[%c0_21, %c0_22] : memref<1x128xf32, #tpu.memory_space<vmem>>, vector<1x128xf32>
    %33 = arith.truncf %32 : vector<1x128xf32> to vector<1x128xbf16>
    %34 = vector.broadcast %33 : vector<1x128xbf16> to vector<8x128xbf16>
    %35 = arith.addf %31, %34 : vector<8x128xbf16>
    %cst_23 = arith.constant 0.000000e+00 : bf16
    %36 = vector.broadcast %cst_23 : bf16 to vector<8x128xbf16>
    %37 = arith.maximumf %35, %36 : vector<8x128xbf16>
    %38 = arith.extf %37 : vector<8x128xbf16> to vector<8x128xf32>
    %c0_24 = arith.constant 0 : index
    %c0_25 = arith.constant 0 : index
    %39 = vector.load %arg10[%c0_24, %c0_25] : memref<1x128xf32, #tpu.memory_space<vmem>>, vector<1x128xf32>
    %40 = vector.broadcast %39 : vector<1x128xf32> to vector<8x128xf32>
    %41 = arith.mulf %38, %40 : vector<8x128xf32>
    %cst_26 = arith.constant dense<0.000000e+00> : vector<8xf32>
    %42 = vector.multi_reduction <add>, %41, %cst_26 [1] : vector<8x128xf32> to vector<8xf32>
    %43 = vector.shape_cast %42 : vector<8xf32> to vector<8x1xf32>
    %c0_27 = arith.constant 0 : index
    %c0_28 = arith.constant 0 : index
    %44 = vector.load %arg11[%c0_27, %c0_28] : memref<1x1xf32, #tpu.memory_space<vmem>>, vector<1x1xf32>
    %45 = vector.broadcast %44 : vector<1x1xf32> to vector<8x1xf32>
    %46 = arith.addf %43, %45 : vector<8x1xf32>
    %c0_29 = arith.constant 0 : index
    %c0_30 = arith.constant 0 : index
    %47 = vector.load %arg12[%c0_29, %c0_30] : memref<8x1xf32, #tpu.memory_space<vmem>>, vector<8x1xf32>
    tpu.vector_store %arg12[%c0_29, %c0_30], %46 {strides = array<i32>} : memref<8x1xf32, #tpu.memory_space<vmem>>, vector<8x1xf32>,
    return
  }
  func.func @transform_0(%arg0: i32) -> (i32, i32) {
    %c0_i32 = arith.constant 0 : i32
    %c0_i32_0 = arith.constant 0 : i32
    return %arg0, %c0_i32 : i32, i32
  }
  func.func @transform_1(%arg0: i32) -> (i32, i32) {
    %c0_i32 = arith.constant 0 : i32
    %c0_i32_0 = arith.constant 0 : i32
    %c0_i32_1 = arith.constant 0 : i32
    return %c0_i32, %c0_i32_0 : i32, i32
  }
  func.func @transform_2(%arg0: i32) -> (i32, i32) {
    %c0_i32 = arith.constant 0 : i32
    %c0_i32_0 = arith.constant 0 : i32
    %c0_i32_1 = arith.constant 0 : i32
    return %c0_i32, %c0_i32_0 : i32, i32
  }
  func.func @transform_3(%arg0: i32) -> (i32, i32) {
    %c0_i32 = arith.constant 0 : i32
    %c0_i32_0 = arith.constant 0 : i32
    %c0_i32_1 = arith.constant 0 : i32
    return %c0_i32, %c0_i32_0 : i32, i32
  }
  func.func @transform_4(%arg0: i32) -> (i32, i32) {
    %c0_i32 = arith.constant 0 : i32
    %c0_i32_0 = arith.constant 0 : i32
    %c0_i32_1 = arith.constant 0 : i32
    return %c0_i32, %c0_i32_0 : i32, i32
  }
  func.func @transform_5(%arg0: i32) -> (i32, i32) {
    %c0_i32 = arith.constant 0 : i32
    %c0_i32_0 = arith.constant 0 : i32
    %c0_i32_1 = arith.constant 0 : i32
    return %c0_i32, %c0_i32_0 : i32, i32
  }
  func.func @transform_6(%arg0: i32) -> (i32, i32) {
    %c0_i32 = arith.constant 0 : i32
    %c0_i32_0 = arith.constant 0 : i32
    %c0_i32_1 = arith.constant 0 : i32
    return %c0_i32, %c0_i32_0 : i32, i32
  }
  func.func @transform_7(%arg0: i32) -> (i32, i32) {
    %c0_i32 = arith.constant 0 : i32
    %c0_i32_0 = arith.constant 0 : i32
    %c0_i32_1 = arith.constant 0 : i32
    return %c0_i32, %c0_i32_0 : i32, i32
  }
  func.func @transform_8(%arg0: i32) -> (i32, i32) {
    %c0_i32 = arith.constant 0 : i32
    %c0_i32_0 = arith.constant 0 : i32
    %c0_i32_1 = arith.constant 0 : i32
    return %c0_i32, %c0_i32_0 : i32, i32
  }
  func.func @transform_9(%arg0: i32) -> (i32, i32) {
    %c0_i32 = arith.constant 0 : i32
    %c0_i32_0 = arith.constant 0 : i32
    %c0_i32_1 = arith.constant 0 : i32
    return %c0_i32, %c0_i32_0 : i32, i32
  }
  func.func @transform_10(%arg0: i32) -> (i32, i32) {
    %c0_i32 = arith.constant 0 : i32
    %c0_i32_0 = arith.constant 0 : i32
    %c0_i32_1 = arith.constant 0 : i32
    return %c0_i32, %c0_i32_0 : i32, i32
  }
  func.func @transform_11(%arg0: i32) -> (i32, i32) {
    %c0_i32 = arith.constant 0 : i32
    %c0_i32_0 = arith.constant 0 : i32
    return %arg0, %c0_i32 : i32, i32
  }
}

</mosaic_0001>

<bundles_post_ra>
// kernel: tpu_custom_call.1
= control target key start
LH: loop header
LB: loop body
LE: loop exit
PB: predicated region body
PF: predicated region fallthrough
CT: control target
= control target key end

     0   :  { %s1607_s0 = inlined_call_operand.hbm [shape: f32[16,84], index: 0, kind: input, shape index: {}]   ;;  %s1608_s1 = inlined_call_operand.hbm [shape: bf16[84,128], index: 1, kind: input, shape index: {}]   ;;  %s1609_s2 = inlined_call_operand.vmem [shape: f32[1,128], index: 2, kind: input, shape index: {}]   ;;  %s1610_s3 = inlined_call_operand.hbm [shape: bf16[128,128], index: 3, kind: input, shape index: {}]   ;;  %s1611_s4 = inlined_call_operand.vmem [shape: f32[1,128], index: 4, kind: input, shape index: {}]   ;;  %s1612_s5 = inlined_call_operand.hbm [shape: bf16[128,128], index: 5, kind: input, shape index: {}]   ;;  %s1613_s6 = inlined_call_operand.vmem [shape: f32[1,128], index: 6, kind: input, shape index: {}]   ;;  %s1614_s7 = inlined_call_operand.hbm [shape: bf16[128,128], index: 7, kind: input, shape index: {}]   ;;  %s1615_s8 = inlined_call_operand.vmem [shape: f32[1,128], index: 8, kind: input, shape index: {}]   ;;  %s1616_s9 = inlined_call_operand.vmem [shape: f32[1,128], index: 9, kind: input, shape index: {}]   ;;  %s1617_s10 = inlined_call_operand.<no memory space> [shape: f32[1,1], index: 10, kind: input, shape index: {}]   ;;  %s1618_s11 = inlined_call_operand.vmem [shape: f32[16,1], index: 11, kind: output, shape index: {}]  }
   0x1   :  { %v16_v0 = vstv %s1617_s10 }
   0x2   :  { %17 = vst [vmem:[#allocation2] sm:$0x1] %v16_v0 }
   0x3   :  { %18 = vsyncpa [#allocation4], 0 }
   0x4   :  { %20 = vsyncpa [#allocation4 + $0x1], 0 }
   0x5   :  { %21 = vsyncpa [#allocation6], 0 }
   0x6   :  { %22 = vsyncpa [#allocation9], 0  ;;  %s1456_s19 = smov 0   ;;  %s1458_s20 = smov 0  }
   0x7   :  { %s1460_s21 = smov 0   ;;  %s1462_s22 = smov 0  }
   0x8 LB: > { %s306_s24 = sshll.u32 %s1608_s1, 4  ;;  %s1480_s25 = sadd.s32 4294967295, %s1385_s22   ;;  %s1385_s22 = sphi %s1462_s22, %s1626_s22   ;;  %s1381_s21 = sphi %s1460_s21, %s1625_s21   ;;  %s1377_s20 = sphi %s1458_s20, %s1624_s20   ;;  %s1373_s19 = sphi %s1456_s19, %s1623_s19   ;;  %s307_s24 = int_to_ptr.hbm [resolvable:$true] %s306_s24 }
   0x9   : > { %p946_p0 = scmp.ge.s32.totalorder %s1385_s22, 1  ;;  %p49_p1 = scmp.eq.s32.totalorder %s1480_s25, 0 }
   0xa   : > { %p295_p2 = scmp.lt.s32.totalorder %s1385_s22, 3  ;;  %s1387_s27 = smov [#allocation5]  }
   0xb   : > { %s308_s28 = sshll.u32 %s1387_s27, 4  ;;  %s340_s12 = sshll.u32 %s1612_s5, 4  ;;  %s309_s28 = int_to_ptr.vmem [resolvable:$true] %s308_s28  ;;  %s341_s12 = int_to_ptr.hbm [resolvable:$true] %s340_s12 }
   0xc   : > { %p1485_p3 = pnand %p946_p0, %p295_p2  ;;  %s323_s16 = sshll.u32 %s1610_s3, 4  ;;  %s324_s16 = int_to_ptr.hbm [resolvable:$true] %s323_s16 }
   0xd   : > { %s1388_s17 = smov [#allocation8]   ;;  %s1389_s10 = smov 64  }
   0xe   : > { %p1127_p4 = pneg %p1485_p3  ;;  %s342_s18 = sshll.u32 %s1388_s17, 4  ;;  %s343_s18 = int_to_ptr.vmem [resolvable:$true] %s342_s18 }
   0xf   : > { %s1390_s23 = smov 4   ;;  %s357_s30 = sshll.u32 %s1614_s7, 4  ;;  %s358_s30 = int_to_ptr.hbm [resolvable:$true] %s357_s30 }
  0x10   : > { %p1496_p5 = pnand %p1127_p4, %p49_p1  ;;  %s1391_s14 = smov [#allocation7]  }
  0x11   : > { %s325_s15 = sshll.u32 %s1391_s14, 4  ;;  %p42_p7 = scmp.ne.s32.totalorder %s1381_s21, %s1377_s20  ;;  %s326_s15 = int_to_ptr.vmem [resolvable:$true] %s325_s15 }
  0x12   : > { %1130 = dma.hbm_to_vmem [thread:$0]  (!%p1496_p5), %s307_s24, 704, %s309_s28, [#allocation6], %s1389_s10, %s1389_s10, %s1390_s23  }
  0x13   : > { %1136 = dma.hbm_to_vmem [thread:$0]  (!%p1496_p5), %s341_s12, 1024, %s343_s18, [#allocation9], %s1389_s10, %s1389_s10, %s1390_s23  }
  0x14   : > { %1133 = dma.hbm_to_vmem [thread:$0]  (!%p1496_p5), %s324_s16, 1024, %s326_s15, [#allocation6], %s1389_s10, %s1389_s10, %s1390_s23  }
  0x15   : > { %s1392_s24 = smov [#allocation10]   ;;  %s1515_s12 = sadd.s32 1, %s1385_s22  }
  0x16   : > { %s359_s28 = sshll.u32 %s1392_s24, 4  ;;  %s32_s17 = ssub.s32 %s1385_s22, %s1515_s12  ;;  %s360_s28 = int_to_ptr.vmem [resolvable:$true] %s359_s28 }
  0x17   : > { %1139 = dma.hbm_to_vmem [thread:$0]  (!%p1496_p5), %s358_s30, 1024, %s360_s28, [#allocation9], %s1389_s10, %s1389_s10, %s1390_s23  }
  0x18   : > { %s35_s18 = sadd.s32 1, %s1381_s21  ;;  %p33_p6 = scmp.eq.s32.totalorder %s32_s17, 0 }
  0x19   : > { %p43_p8 = scmp.eq.s32.totalorder %s1385_s22, 0  ;;  %p48_p9 = scmp.ne.s32.totalorder %s1377_s20, %s1373_s19 }
  0x1a   : > { %s1526_s27 = scalar_select %p33_p6, %s1381_s21, %s35_s18  }
  0x1b   : > { %p1530_p10 = por %p49_p1, %p48_p9  ;;  %p1148_p11 = scmp.lt.s32.totalorder %s1385_s22, 2 }
  0x1c   : > { %s382_s29 = sand.u32 1, %s1381_s21   ;;  %s953_s13 = sshll.u32 %s1385_s22, 3 }
  0x1d   : > { %p44_p12 = por %p43_p8, %p42_p7  ;;  %s952_s10 = sshll.u32 %s382_s29, 3 }
  0x1e   : > { %s390_s14 = scalar_lea.hbm %s1607_s0, %s953_s13  ;;  %s386_s24 = scalar_lea.vmem [#allocation3], %s952_s10 }
  0x1f   : > { %s392_s15 = sshll.u32 %s390_s14, 4  ;;  %s394_s28 = sshll.u32 %s386_s24, 4  ;;  %s393_s15 = int_to_ptr.hbm [resolvable:$true] %s392_s15  ;;  %s395_s28 = int_to_ptr.vmem [resolvable:$true] %s394_s28 }
  0x20   : > { %p1540_p13 = pnand %p1148_p11, %p44_p12  ;;  %s383_s17 = scalar_lea.sflag [#allocation4], %s382_s29 }
  0x21   : > { %s1313_s18 = sshra.s32 %s393_s15, 4  ;;  %s1320_s10 = scalar_lea.hbm %s1607_s0, 16  ;;  %s1314_s18 = int_to_ptr.hbm [resolvable:$true] %s1313_s18 }
  0x22   : > { %s1315_s22 = scalar_lea.hbm %s1314_s18, 8  ;;  %p1317_p2 = pneg %p1540_p13 }
  0x23   : > { %p1316_p0 = scmp.ne.s32.totalorder %s1314_s18, %s1315_s22  ;;  %p1321_p6 = scmp.lt.s32.totalorder %s1314_s18, %s1607_s0 }
  0x24   : > { %p1322_p7 = scmp.lt.s32.totalorder %s1320_s10, %s1315_s22 }
  0x25   : > { %p1318_p4 = pnand %p1317_p2, %p1316_p0 }
  0x26   : > { %p1323_p8 = por %p1322_p7, %p1321_p6 }
  0x27   : > { %p1319_p5 = pneg %p1318_p4 }
  0x29   : > { %p1324_p9 = pnand %p1323_p8, %p1319_p5 }
  0x2b   : > { %1327 = shalt.err (!%p1324_p9)
}
  0x2c   : > { %1143 = dma.hbm_to_vmem [thread:$0]  (!%p1540_p13), %s393_s15, 128, %s395_s28, %s383_s17  }
  0x2d   : > { %403 = sbr.rel (%p1485_p3) target bundleno = 763 (0x2fb), region = 64  ;;  %s405_s29 = sand.u32 (!%p1485_p3), 1, %s1377_s20  }
  0x2e   : > { %s1557_s24 = sshll.u32 (!%p1485_p3), %s405_s29, 3  ;;  %s406_s13 = scalar_lea.sflag (!%p1485_p3), [#allocation4], %s405_s29 }
  0x2f   : > { %s409_s23 = scalar_lea.vmem (!%p1485_p3), [#allocation3], %s1557_s24 }
  0x32   : > { %1360 = dma.done.wait (%p1530_p10), %s406_s13, 128  }
  0x33   : > { %1362 = vsyncadd (%p1530_p10), %s406_s13, 4294967168 }
  0x34   : > { %1364 = dma.done.wait (%p49_p1), [#allocation6], 1728  }
  0x35   : > { %1366 = vsyncadd (%p49_p1), [#allocation6], 4294965568 }
  0x36   : > { %1368 = dma.done.wait (%p49_p1), [#allocation9], 2048  }
  0x37   : > { %1370 = vsyncadd (%p49_p1), [#allocation9], 4294965248  ;;  %v485_v1 = vld [vmem:[#allocation5 + $0x28] sm:$0x3]  ;;  %vm523_vm0 = vcmask 1041408   ;;  %v1091_v5 = vld [vmem:[#allocation7 + $0x30] sm:$0xff] }
  0x38   : > { %v507_v2 = vunpack.c.l.b16 %v485_v1  ;;  %v1092_v3 = vld [vmem:[#allocation7 + $0x38] sm:$0xff]  ;;  %v1090_v8 = vld [vmem:[#allocation7 + $0x28] sm:$0xff]  ;;  %v1089_v10 = vld [vmem:[#allocation7 + $0x20] sm:$0xff]  ;;  %vm519_vm1 = vcmask 687104   ;;  %p468_p1 = scmp.lt.s32.totalorder %s1480_s25, 1  ;;  %vm840_vm2 = vcmask 7168  }
  0x39   : > { %618 = vmatpush.bf16.msra.mxu1 %v1092_v3  ;;  %v1084_v7 = vld [vmem:[#allocation5 + $0x20] sm:$0xff]  ;;  %v1083_v9 = vld [vmem:[#allocation5 + $0x18] sm:$0xff]  ;;  %v1082_v11 = vld [vmem:[#allocation5 + $0x10] sm:$0xff] }
  0x3a   : > { %v513_v4 = vpack.c.b16 %v507_v2, %v507_v2  ;;  %v1088_v12 = vld [vmem:[#allocation7 + $0x18] sm:$0xff]  ;;  %v473_v15 = vld [vmem:[%s409_s23] sm:$0xff]  ;;  %v541_v23 = vld [vmem:[%s1609_s2] sm:$0x1]  ;;  %s1628_s25 = smov (!%p468_p1, %s1480_s25), 1 }
  0x3b   : > { %v1081_v13 = vld [vmem:[#allocation5 + $0x8] sm:$0xff]  ;;  %v1080_v14 = vld [vmem:[#allocation5] sm:$0xff]  ;;  %v474_v16 = vpack.c.bf16 %v473_v15, %v473_v15  ;;  %v1086_v18 = vld [vmem:[#allocation7 + $0x8] sm:$0xff]  ;;  %v542_v24 = vpack.c.bf16 %v541_v23, %v541_v23  ;;  %s960_s14 = sshll.u32 %s1628_s25, 3 }
  0x3c   : > { %v525_v6 = vsel %vm523_vm0, %v513_v4, 0  ;;  %v1087_v17 = vld [vmem:[#allocation7 + $0x10] sm:$0xff]  ;;  %v1085_v19 = vld [vmem:[#allocation7] sm:$0xff]  ;;  %v1100_v20 = vld [vmem:[#allocation8 + $0x38] sm:$0xff]  ;;  %s471_s13 = scalar_lea.vmem %s1618_s11, %s960_s14 }
  0x3d   : > { %529 = vmatpush.bf16.msra.mxu0 %v525_v6  ;;  %619 = vmatpush.bf16.msra.mxu1 %v1091_v5  ;;  %v1099_v21 = vld [vmem:[#allocation8 + $0x30] sm:$0xff]  ;;  %v1098_v22 = vld [vmem:[#allocation8 + $0x28] sm:$0xff]  ;;  %v1097_v25 = vld [vmem:[#allocation8 + $0x20] sm:$0xff]  ;;  %v544_v26 = vpack.i.b16 %v542_v24, %v542_v24 }
  0x3e   : > { %709 = vmatpush.bf16.msra.mxu2 %v1100_v20  ;;  %v1096_v27 = vld [vmem:[#allocation8 + $0x18] sm:$0xff]  ;;  %v1095_v37 = vld [vmem:[#allocation8 + $0x10] sm:$0xff]  ;;  %v1094_v38 = vld [vmem:[#allocation8 + $0x8] sm:$0xff] }
  0x3f   : > { %v546_v28 = vperm.slane %v544_v26, 0  ;;  %v1093_v39 = vld [vmem:[#allocation8] sm:$0xff]  ;;  %v1108_v40 = vld [vmem:[#allocation10 + $0x38] sm:$0xff]  ;;  %v1107_v41 = vld [vmem:[#allocation10 + $0x30] sm:$0xff] }
  0x40   : > { %800 = vmatpush.bf16.msra.mxu3 %v1108_v40  ;;  %v1106_v42 = vld [vmem:[#allocation10 + $0x28] sm:$0xff]  ;;  %v632_v43 = vld [vmem:[%s1611_s4] sm:$0x1]  ;;  %v1104_v47 = vld [vmem:[#allocation10 + $0x18] sm:$0xff] }
  0x41   : > { %530 = vmatpush.bf16.msra.mxu0 %v1084_v7  ;;  %620 = vmatpush.bf16.msra.mxu1 %v1090_v8  ;;  %v548_v31 = vunpack.c.l.bf16 %v546_v28  ;;  %v633_v44 = vpack.c.bf16 %v632_v43, %v632_v43  ;;  %v1105_v45 = vld [vmem:[#allocation10 + $0x20] sm:$0xff]  ;;  %v1103_v57 = vld [vmem:[#allocation10 + $0x10] sm:$0xff]  ;;  %v1102_v58 = vld [vmem:[#allocation10 + $0x8] sm:$0xff] }
  0x42   : > { %710 = vmatpush.bf16.msra.mxu2 %v1099_v21  ;;  %v1101_v59 = vld [vmem:[#allocation10] sm:$0xff] }
  0x43   : > { %v635_v46 = vpack.i.b16 %v633_v44, %v633_v44  ;;  %v723_v60 = vld [vmem:[%s1613_s6] sm:$0x1] }
  0x44   : > { %801 = vmatpush.bf16.msra.mxu3 %v1107_v41  ;;  %v724_v61 = vpack.c.bf16 %v723_v60, %v723_v60  ;;  %v814_v8 = vld [vmem:[%s1615_s8] sm:$0x1] }
  0x45   : > { %531 = vmatpush.bf16.msra.mxu0 %v1083_v9  ;;  %621 = vmatpush.bf16.msra.mxu1 %v1089_v10  ;;  %v637_v48 = vperm.slane %v635_v46, 0  ;;  %v815_v9 = vpack.c.bf16 %v814_v8, %v814_v8  ;;  %v1191_v20 = vld [vmem:[%s1616_s9] ss:$0 sm:$0xff] }
  0x46   : > { %711 = vmatpush.bf16.msra.mxu2 %v1098_v22  ;;  %v726_v62 = vpack.i.b16 %v724_v61, %v724_v61  ;;  %v1192_v23 = vld [vmem:[#allocation2] ss:$0 sm:$0xff] }
  0x47   : > { %v639_v51 = vunpack.c.l.bf16 %v637_v48  ;;  %v817_v10 = vpack.i.b16 %v815_v9, %v815_v9 }
  0x48   : > { %802 = vmatpush.bf16.msra.mxu3 %v1106_v42  ;;  %v728_v63 = vperm.slane %v726_v62, 0 }
  0x49   : > { %532 = vmatpush.bf16.msra.mxu0 %v1082_v11  ;;  %622 = vmatpush.bf16.msra.mxu1 %v1088_v12  ;;  %v819_v11 = vperm.slane %v817_v10, 0 }
  0x4a   : > { %712 = vmatpush.bf16.msra.mxu2 %v1097_v25  ;;  %v730_v2 = vunpack.c.l.bf16 %v728_v63 }
  0x4c   : > { %803 = vmatpush.bf16.msra.mxu3 %v1105_v45 }
  0x4d   : > { %533 = vmatpush.bf16.msra.mxu0 %v1081_v13  ;;  %623 = vmatpush.bf16.msra.mxu1 %v1087_v17 }
  0x4e   : > { %713 = vmatpush.bf16.msra.mxu2 %v1096_v27 }
  0x50   : > { %804 = vmatpush.bf16.msra.mxu3 %v1104_v47 }
  0x51   : > { %534 = vmatpush.bf16.msra.mxu0 %v1080_v14  ;;  %624 = vmatpush.bf16.msra.mxu1 %v1086_v18  ;;  %v821_v14 = vunpack.c.l.bf16 %v819_v11 }
  0x52   : > { %714 = vmatpush.bf16.msra.mxu2 %v1095_v37 }
  0x54   : > { %981 = vmatmul.msk.bf16.vlgmr.msra.gmra.mxu0 %vm519_vm1, %v474_v16  ;;  %805 = vmatpush.bf16.msra.mxu3 %v1103_v57 }
  0x55   : > { %625 = vmatpush.bf16.msra.mxu1 %v1085_v19 }
  0x56   : > { %715 = vmatpush.bf16.msra.mxu2 %v1094_v38 }
  0x58   : > { %806 = vmatpush.bf16.msra.mxu3 %v1102_v58 }
  0x5a   : > { %716 = vmatpush.bf16.msra.mxu2 %v1093_v39 }
  0x5c   : > { %807 = vmatpush.bf16.msra.mxu3 %v1101_v59 }
  0xd1   : > { %v536_v29 = vpop.f32.mrf.mxu0 }
  0xd2   : > { %v540_v30 = vpack.c.bf16 %v536_v29, %v536_v29 }
  0xd4   : > { %v547_v32 = vunpack.c.l.bf16 %v540_v30 }
  0xd6   : > { %v549_v33 = vadd.f32 %v548_v31, %v547_v32 }
  0xd8   : > { %v552_v34 = vmax.f32 %v549_v33, 0.0 }
  0xd9   : > { %v538_v35 = vpop.f32.mrf.mxu0 }
  0xda   : > { %v553_v36 = vpack.c.bf16 %v552_v34, %v552_v34 }
  0xdc   : > { %626 = vmatmul.bf16.vlgmr.msra.gmra.mxu1 %v553_v36 }
 0x159   : > { %v627_v49 = vpop.f32.mrf.mxu1 }
 0x15a   : > { %v631_v50 = vpack.c.bf16 %v627_v49, %v627_v49 }
 0x15c   : > { %v638_v52 = vunpack.c.l.bf16 %v631_v50 }
 0x15e   : > { %v640_v53 = vadd.f32 %v639_v51, %v638_v52 }
 0x160   : > { %v643_v54 = vmax.f32 %v640_v53, 0.0 }
 0x161   : > { %v629_v55 = vpop.f32.mrf.mxu1 }
 0x162   : > { %v644_v56 = vpack.c.bf16 %v643_v54, %v643_v54 }
 0x164   : > { %717 = vmatmul.bf16.vlgmr.msra.gmra.mxu2 %v644_v56 }
 0x1e7   : > { %v718_v0 = vpop.f32.mrf.mxu2 }
 0x1e8   : > { %v722_v1 = vpack.c.bf16 %v718_v0, %v718_v0 }
 0x1ea   : > { %v729_v3 = vunpack.c.l.bf16 %v722_v1 }
 0x1ec   : > { %v731_v4 = vadd.f32 %v730_v2, %v729_v3 }
 0x1ee   : > { %v734_v5 = vmax.f32 %v731_v4, 0.0 }
 0x1ef   : > { %v720_v6 = vpop.f32.mrf.mxu2 }
 0x1f0   : > { %v735_v7 = vpack.c.bf16 %v734_v5, %v734_v5 }
 0x1f2   : > { %808 = vmatmul.bf16.vlgmr.msra.gmra.mxu3 %v735_v7 }
 0x275   : > { %v809_v12 = vpop.f32.mrf.mxu3 }
 0x276   : > { %v813_v13 = vpack.c.bf16 %v809_v12, %v809_v12 }
 0x278   : > { %v820_v15 = vunpack.c.l.bf16 %v813_v13 }
 0x27a   : > { %v822_v16 = vadd.f32 %v821_v14, %v820_v15 }
 0x27c   : > { %v825_v17 = vmax.f32 %v822_v16, 0.0 }
 0x27d   : > { %v811_v18 = vpop.f32.mrf.mxu3 }
 0x27e   : > { %v826_v19 = vpack.c.bf16 %v825_v17, %v825_v17 }
 0x280   : > { %v827_v21 = vunpack.c.l.bf16 %v826_v19 }
 0x282   : > { %v832_v22 = vmul.f32 %v1191_v20, %v827_v21 }
 0x284   : > { %833 = vadd.xlane.f32.xlu0 %v832_v22 }
 0x2f7   : > { %v834_v24 = vpop.xlane.xlu0 %833 }
 0x2f8   : > { %v839_v25 = vadd.f32 %v1192_v23, %v834_v24 }
 0x2fa   : > { %841 = vst.msk [vmem:[%s471_s13] sm:$0xff] %vm840_vm2, %v839_v25 }
 0x2fb PF: > { %p25_p3 = scmp.ge.s32.totalorder %s1515_s12, 4   ;;  %s1623_s19 = smov %s1377_s20 }
 0x2fc   : > { %s1624_s20 = smov %s1381_s21  ;;  %s1625_s21 = smov %s1526_s27 }
 0x2fd   : > { %s1626_s22 = smov %s1515_s12  ;;  %27 = sbr.rel (!%p25_p3) target bundleno = 8 (0x8), region = 120 }
 0x302   :  { %861 = vsyncpa [#allocation4], 1 }
 0x303   :  { %863 = vsyncpa [#allocation4 + $0x1], 1 }
 0x304   :  { %864 = vsyncpa [#allocation6], 1 }
 0x305   :  { %865 = vsyncpa [#allocation9], 1 }

</bundles_post_ra>
